<compile_context>
chip_gen: v6e
topology: v6e:2x2x1
jax: 0.10.0
libtpu: 0.0.40
codegen_flags: <defaults>
</compile_context>

<pallas_src>
import jax
import jax.numpy as jnp
from jax import lax
from jax.experimental import pallas as pl
from jax.experimental.pallas import tpu as pltpu

_EPS = 1e-6
_LANES = 512            # lane-dense columns (multiple of 128)
_MAX_TILE_ROWS = 1024   # 1024 * 512 * 4B = 2 MiB per f32 input block


def _cdiv(a: int, b: int) -> int:
    return -(-a // b)


def _log_pq(pos_f32, neg_f32):
    """log(p*q) with the reference clipping; accumulated positive, negated at the end."""
    p = jnp.clip(0.5 * pos_f32 + 0.5, _EPS, 1.0 - _EPS)   # P(positive)
    q = jnp.clip(0.5 - 0.5 * neg_f32, _EPS, 1.0 - _EPS)   # 1 - P(negative)
    return jnp.log(p * q)                                  # one EUP log per element


def _fold_rows(x):
    """(R, C) -> (8, C) by adding 8-row-aligned slabs.  R must be a multiple of 8.

    All slices are static and (8,128)-tile aligned, so this lowers to pure VPU vreg
    adds (no XLU cross-lane work, no relayout copies).
    """
    r = x.shape[0]
    if r == 8:
        return x
    half = ((r // 2) // 8) * 8
    return _fold_rows(x[:half, :]) + _fold_rows(x[half:, :])


def _fold_cols(x):
    """(8, C) -> (8, 128) by adding 128-lane-aligned slabs.  C must be a multiple of 128."""
    c = x.shape[1]
    if c == 128:
        return x
    half = ((c // 2) // 128) * 128
    return _fold_cols(x[:, :half]) + _fold_cols(x[:, half:])


def _make_kernel(tile_rows: int, cols: int, num_tiles: int, valid_last: int):
    ragged = valid_last != tile_rows

    def kernel(pos_ref, neg_ref, out_ref):
        t = pl.program_id(0)

        @pl.when(t == 0)
        def _init():
            out_ref[...] = jnp.zeros_like(out_ref)

        # Cast in-kernel (inputs may be bf16); compute in f32.
        logpq = _log_pq(pos_ref[...].astype(jnp.float32),
                        neg_ref[...].astype(jnp.float32))

        def accumulate_full():
            out_ref[...] += _fold_cols(_fold_rows(logpq))

        if not ragged:
            accumulate_full()
        else:
            # All tiles except the last one carry only valid rows: zero mask cost.
            @pl.when(t < num_tiles - 1)
            def _full():
                accumulate_full()

            # Only the last (ragged) tile pays for masking the out-of-bounds rows.
            @pl.when(t == num_tiles - 1)
            def _partial():
                v8 = (valid_last // 8) * 8      # whole sublane-aligned valid rows
                rem = valid_last - v8           # 0..7 leftover valid rows
                acc = jnp.zeros((8, cols), jnp.float32)
                if v8 > 0:
                    acc = _fold_rows(logpq[:v8, :])
                if rem > 0:
                    row_ids = lax.broadcasted_iota(jnp.int32, (8, 1), 0)
                    acc = acc + jnp.where(row_ids < rem, logpq[v8:v8 + 8, :], 0.0)
                out_ref[...] += _fold_cols(acc)

    return kernel


def reranker_bce_loss(positives: jax.Array, negatives: jax.Array, *,
                      lanes: int = _LANES,
                      max_tile_rows: int = _MAX_TILE_ROWS) -> jax.Array:
    """Pallas TPU reranker BCE loss.  Returns a scalar f32."""
    assert positives.shape == negatives.shape, "positives/negatives must match"
    assert positives.ndim == 1
    assert lanes % 128 == 0 and lanes >= 128
    n = positives.shape[0]
    itemsize = jnp.dtype(positives.dtype).itemsize
    granule = {4: 8, 2: 16, 1: 32}.get(itemsize, 8)   # min sublane rows per dtype
    assert max_tile_rows % granule == 0

    # Prefer a column count that divides N exactly -> free metadata reshape, no copy.
    cols = lanes
    if n % cols != 0:
        for c in (256, 128):
            if c < lanes and n % c == 0 and (n // c) >= granule:
                cols = c
                break

    rows = n // cols
    n_main = rows * cols

    if rows >= granule:
        tile_rows = min(max_tile_rows, (rows // granule) * granule)
        num_tiles = _cdiv(rows, tile_rows)
        valid_last = rows - (num_tiles - 1) * tile_rows

        # Free reshape when cols divides n; otherwise a prefix slice feeds the kernel
        # and the < cols tail is handled in plain JAX below (no full-array padding).
        pos2d = positives[:n_main].reshape(rows, cols)
        neg2d = negatives[:n_main].reshape(rows, cols)

        partial = pl.pallas_call(
            _make_kernel(tile_rows, cols, num_tiles, valid_last),
            out_shape=jax.ShapeDtypeStruct((8, 128), jnp.float32),
            grid=(num_tiles,),
            in_specs=[
                pl.BlockSpec((tile_rows, cols), lambda t: (t, 0)),
                pl.BlockSpec((tile_rows, cols), lambda t: (t, 0)),
            ],
            # Resident accumulator block across the (reduction) grid axis.
            out_specs=pl.BlockSpec((8, 128), lambda t: (0, 0)),
            compiler_params=pltpu.CompilerParams(
                dimension_semantics=("arbitrary",),
            ),
            cost_estimate=pl.CostEstimate(
                flops=12 * n_main,
                transcendentals=n_main,
                bytes_accessed=2 * n_main * itemsize + 8 * 128 * 4,
            ),
        )(pos2d, neg2d)
        main_sum = jnp.sum(partial)
    else:
        # Too few rows for a lane-dense tile; everything goes through the tail path.
        n_main = 0
        main_sum = jnp.float32(0.0)

    if n_main < n:
        tail_sum = jnp.sum(_log_pq(positives[n_main:].astype(jnp.float32),
                                   negatives[n_main:].astype(jnp.float32)))
    else:
        tail_sum = jnp.float32(0.0)

    # mean(-log p) + mean(-log q) == -(sum log(p*q)) / N
    return -(main_sum + tail_sum) / n


def reranker_bce_loss_ref(positives, negatives):
    # Pure-JAX reference mirroring the PyTorch semantics.
    # TODO(synk): torch.nn.BCELoss clamps the log output at -100 instead of clipping
    # the input probability; results differ only for scores within 1e-6 of +/-1.
    p = jnp.clip((positives.astype(jnp.float32) + 1.0) / 2.0, _EPS, 1.0 - _EPS)
    q = jnp.clip((negatives.astype(jnp.float32) + 1.0) / 2.0, _EPS, 1.0 - _EPS)
    return jnp.mean(-jnp.log(p)) + jnp.mean(-jnp.log(1.0 - q))


if __name__ == "__main__":
    key = jax.random.PRNGKey(0)
    k_pos, k_neg = jax.random.split(key)

    # 1) N multiple of 512 -> zero-copy reshape fast path; 12 rows -> 2 tiles with a
    #    ragged (4-valid-row) last tile.
    n1 = 12 * 512
    pos1 = jax.random.uniform(k_pos, (n1,), jnp.float32, minval=-1.0, maxval=1.0)
    neg1 = jax.random.uniform(k_neg, (n1,), jnp.float32, minval=-1.0, maxval=1.0)
    out1 = reranker_bce_loss(pos1, neg1)
    jax.block_until_ready(out1)
    ref1 = reranker_bce_loss_ref(pos1, neg1)
    assert jnp.allclose(out1, ref1, rtol=1e-5, atol=1e-5), (out1, ref1)

    # 2) Non-multiple N: 3-tile grid, sub-8-row ragged mask, <128-element tail in JAX.
    n2 = 5000
    pos2 = jax.random.uniform(k_neg, (n2,), jnp.float32, minval=-1.0, maxval=1.0)
    neg2 = jax.random.uniform(k_pos, (n2,), jnp.float32, minval=-1.0, maxval=1.0)
    out2 = reranker_bce_loss(pos2, neg2, lanes=128, max_tile_rows=16)
    jax.block_until_ready(out2)
    ref2 = reranker_bce_loss_ref(pos2, neg2)
    assert jnp.allclose(out2, ref2, rtol=1e-5, atol=1e-5), (out2, ref2)

    # 3) bf16 inputs: 16-row granule, single non-ragged tile, in-kernel f32 cast.
    n3 = 32 * 512
    pos3 = jax.random.uniform(k_pos, (n3,), jnp.float32, minval=-1.0, maxval=1.0)
    neg3 = jax.random.uniform(k_neg, (n3,), jnp.float32, minval=-1.0, maxval=1.0)
    out3 = reranker_bce_loss(pos3.astype(jnp.bfloat16), neg3.astype(jnp.bfloat16))
    jax.block_until_ready(out3)
    ref3 = reranker_bce_loss_ref(pos3.astype(jnp.bfloat16), neg3.astype(jnp.bfloat16))
    assert jnp.allclose(out3, ref3, rtol=1e-3, atol=1e-3), (out3, ref3)

    print("KERNEL_OK")
</pallas_src>

<mosaic_0001>
module attributes {stable_mosaic.version = 11 : i64} {
  func.func @kernel(%arg0: i32, %arg1: memref<8x512xf32, #tpu.memory_space<vmem>>, %arg2: memref<8x512xf32, #tpu.memory_space<vmem>>, %arg3: memref<8x128xf32, #tpu.memory_space<vmem>>) attributes {dimension_semantics = [#tpu.dimension_semantics<arbitrary>], iteration_bounds = array<i64: 2>, scalar_prefetch = 0 : i64, scratch_operands = 0 : i64, tpu.core_type = #tpu.core_type<tc>, window_params = [{transform_indices = @transform_0, window_bounds = array<i64: 8, 512>}, {transform_indices = @transform_1, window_bounds = array<i64: 8, 512>}, {pipeline_mode = #tpu.pipeline_mode<synchronous>, transform_indices = @transform_2, window_bounds = array<i64: 8, 128>}]} {
    %c0_i32 = arith.constant 0 : i32
    %0 = arith.cmpi eq, %arg0, %c0_i32 : i32
    %1 = arith.extui %0 : i1 to i32
    %c0_i32_0 = arith.constant 0 : i32
    %2 = arith.cmpi ne, %1, %c0_i32_0 : i32
    scf.if %2 {
      %cst_14 = arith.constant 0.000000e+00 : f32
      %29 = vector.broadcast %cst_14 : f32 to vector<8x128xf32>
      %c0_15 = arith.constant 0 : index
      %c0_16 = arith.constant 0 : index
      %30 = vector.load %arg3[%c0_15, %c0_16] : memref<8x128xf32, #tpu.memory_space<vmem>>, vector<8x128xf32>
      tpu.vector_store %arg3[%c0_15, %c0_16], %29 {strides = array<i32>} : memref<8x128xf32, #tpu.memory_space<vmem>>, vector<8x128xf32>,
    } else {
    }
    %c0 = arith.constant 0 : index
    %c0_1 = arith.constant 0 : index
    %3 = vector.load %arg1[%c0, %c0_1] : memref<8x512xf32, #tpu.memory_space<vmem>>, vector<8x512xf32>
    %c0_2 = arith.constant 0 : index
    %c0_3 = arith.constant 0 : index
    %4 = vector.load %arg2[%c0_2, %c0_3] : memref<8x512xf32, #tpu.memory_space<vmem>>, vector<8x512xf32>
    %cst = arith.constant 5.000000e-01 : f32
    %5 = vector.broadcast %cst : f32 to vector<8x512xf32>
    %6 = arith.mulf %5, %3 : vector<8x512xf32>
    %cst_4 = arith.constant 5.000000e-01 : f32
    %7 = vector.broadcast %cst_4 : f32 to vector<8x512xf32>
    %8 = arith.addf %6, %7 : vector<8x512xf32>
    %cst_5 = arith.constant 9.99999997E-7 : f32
    %cst_6 = arith.constant 0.999998986 : f32
    %9 = vector.broadcast %cst_5 : f32 to vector<8x512xf32>
    %10 = arith.maximumf %9, %8 : vector<8x512xf32>
    %11 = vector.broadcast %cst_6 : f32 to vector<8x512xf32>
    %12 = arith.minimumf %11, %10 : vector<8x512xf32>
    %cst_7 = arith.constant 5.000000e-01 : f32
    %13 = vector.broadcast %cst_7 : f32 to vector<8x512xf32>
    %14 = arith.mulf %13, %4 : vector<8x512xf32>
    %cst_8 = arith.constant 5.000000e-01 : f32
    %15 = vector.broadcast %cst_8 : f32 to vector<8x512xf32>
    %16 = arith.subf %15, %14 : vector<8x512xf32>
    %cst_9 = arith.constant 9.99999997E-7 : f32
    %cst_10 = arith.constant 0.999998986 : f32
    %17 = vector.broadcast %cst_9 : f32 to vector<8x512xf32>
    %18 = arith.maximumf %17, %16 : vector<8x512xf32>
    %19 = vector.broadcast %cst_10 : f32 to vector<8x512xf32>
    %20 = arith.minimumf %19, %18 : vector<8x512xf32>
    %21 = arith.mulf %12, %20 : vector<8x512xf32>
    %22 = math.log %21 : vector<8x512xf32>
    %c1_i32 = arith.constant 1 : i32
    %23 = arith.cmpi slt, %arg0, %c1_i32 : i32
    %24 = arith.extui %23 : i1 to i32
    %c0_i32_11 = arith.constant 0 : i32
    %25 = arith.cmpi ne, %24, %c0_i32_11 : i32
    scf.if %25 {
      %c0_14 = arith.constant 0 : index
      %c0_15 = arith.constant 0 : index
      %29 = vector.load %arg3[%c0_14, %c0_15] : memref<8x128xf32, #tpu.memory_space<vmem>>, vector<8x128xf32>
      %30 = vector.extract_strided_slice %22 {offsets = [0, 0], sizes = [8, 256], strides = [1, 1]} : vector<8x512xf32> to vector<8x256xf32>
      %31 = vector.extract_strided_slice %30 {offsets = [0, 0], sizes = [8, 128], strides = [1, 1]} : vector<8x256xf32> to vector<8x128xf32>
      %32 = vector.extract_strided_slice %30 {offsets = [0, 128], sizes = [8, 128], strides = [1, 1]} : vector<8x256xf32> to vector<8x128xf32>
      %33 = arith.addf %31, %32 : vector<8x128xf32>
      %34 = vector.extract_strided_slice %22 {offsets = [0, 256], sizes = [8, 256], strides = [1, 1]} : vector<8x512xf32> to vector<8x256xf32>
      %35 = vector.extract_strided_slice %34 {offsets = [0, 0], sizes = [8, 128], strides = [1, 1]} : vector<8x256xf32> to vector<8x128xf32>
      %36 = vector.extract_strided_slice %34 {offsets = [0, 128], sizes = [8, 128], strides = [1, 1]} : vector<8x256xf32> to vector<8x128xf32>
      %37 = arith.addf %35, %36 : vector<8x128xf32>
      %38 = arith.addf %33, %37 : vector<8x128xf32>
      %39 = arith.addf %29, %38 : vector<8x128xf32>
      %c0_16 = arith.constant 0 : index
      %c0_17 = arith.constant 0 : index
      %40 = vector.load %arg3[%c0_16, %c0_17] : memref<8x128xf32, #tpu.memory_space<vmem>>, vector<8x128xf32>
      tpu.vector_store %arg3[%c0_16, %c0_17], %39 {strides = array<i32>} : memref<8x128xf32, #tpu.memory_space<vmem>>, vector<8x128xf32>,
    } else {
    }
    %c1_i32_12 = arith.constant 1 : i32
    %26 = arith.cmpi eq, %arg0, %c1_i32_12 : i32
    %27 = arith.extui %26 : i1 to i32
    %c0_i32_13 = arith.constant 0 : i32
    %28 = arith.cmpi ne, %27, %c0_i32_13 : i32
    scf.if %28 {
      %cst_14 = arith.constant 0.000000e+00 : f32
      %29 = vector.broadcast %cst_14 : f32 to vector<8x512xf32>
      %30 = tpu.iota {dimensions = array<i32: 0>} : vector<8x1xi32>
      %c4_i32 = arith.constant 4 : i32
      %31 = vector.broadcast %c4_i32 : i32 to vector<8x1xi32>
      %32 = arith.cmpi slt, %30, %31 : vector<8x1xi32>
      %cst_15 = arith.constant 0.000000e+00 : f32
      %33 = vector.shape_cast %32 : vector<8x1xi1> to vector<8x1xi1>
      %34 = vector.broadcast %33 : vector<8x1xi1> to vector<8x512xi1>
      %35 = vector.broadcast %cst_15 : f32 to vector<8x512xf32>
      %36 = arith.select %34, %22, %35 : vector<8x512xi1>, vector<8x512xf32>
      %37 = arith.addf %29, %36 : vector<8x512xf32>
      %c0_16 = arith.constant 0 : index
      %c0_17 = arith.constant 0 : index
      %38 = vector.load %arg3[%c0_16, %c0_17] : memref<8x128xf32, #tpu.memory_space<vmem>>, vector<8x128xf32>
      %39 = vector.extract_strided_slice %37 {offsets = [0, 0], sizes = [8, 256], strides = [1, 1]} : vector<8x512xf32> to vector<8x256xf32>
      %40 = vector.extract_strided_slice %39 {offsets = [0, 0], sizes = [8, 128], strides = [1, 1]} : vector<8x256xf32> to vector<8x128xf32>
      %41 = vector.extract_strided_slice %39 {offsets = [0, 128], sizes = [8, 128], strides = [1, 1]} : vector<8x256xf32> to vector<8x128xf32>
      %42 = arith.addf %40, %41 : vector<8x128xf32>
      %43 = vector.extract_strided_slice %37 {offsets = [0, 256], sizes = [8, 256], strides = [1, 1]} : vector<8x512xf32> to vector<8x256xf32>
      %44 = vector.extract_strided_slice %43 {offsets = [0, 0], sizes = [8, 128], strides = [1, 1]} : vector<8x256xf32> to vector<8x128xf32>
      %45 = vector.extract_strided_slice %43 {offsets = [0, 128], sizes = [8, 128], strides = [1, 1]} : vector<8x256xf32> to vector<8x128xf32>
      %46 = arith.addf %44, %45 : vector<8x128xf32>
      %47 = arith.addf %42, %46 : vector<8x128xf32>
      %48 = arith.addf %38, %47 : vector<8x128xf32>
      %c0_18 = arith.constant 0 : index
      %c0_19 = arith.constant 0 : index
      %49 = vector.load %arg3[%c0_18, %c0_19] : memref<8x128xf32, #tpu.memory_space<vmem>>, vector<8x128xf32>
      tpu.vector_store %arg3[%c0_18, %c0_19], %48 {strides = array<i32>} : memref<8x128xf32, #tpu.memory_space<vmem>>, vector<8x128xf32>,
    } else {
    }
    return
  }
  func.func @transform_0(%arg0: i32) -> (i32, i32) {
    %c0_i32 = arith.constant 0 : i32
    %c0_i32_0 = arith.constant 0 : i32
    return %arg0, %c0_i32 : i32, i32
  }
  func.func @transform_1(%arg0: i32) -> (i32, i32) {
    %c0_i32 = arith.constant 0 : i32
    %c0_i32_0 = arith.constant 0 : i32
    return %arg0, %c0_i32 : i32, i32
  }
  func.func @transform_2(%arg0: i32) -> (i32, i32) {
    %c0_i32 = arith.constant 0 : i32
    %c0_i32_0 = arith.constant 0 : i32
    %c0_i32_1 = arith.constant 0 : i32
    return %c0_i32, %c0_i32_0 : i32, i32
  }
}

</mosaic_0001>

<bundles_post_ra>
// kernel: tpu_custom_call.1
= control target key start
LH: loop header
LB: loop body
LE: loop exit
PB: predicated region body
PF: predicated region fallthrough
CT: control target
= control target key end

     0   :  { %7 = vsyncpa [#allocation3], 0  ;;  %s742_s0 = inlined_call_operand.hbm [shape: f32[12,512], index: 0, kind: input, shape index: {}]   ;;  %s743_s1 = inlined_call_operand.hbm [shape: f32[12,512], index: 1, kind: input, shape index: {}]   ;;  %s744_s2 = inlined_call_operand.hbm [shape: f32[8,128], index: 2, kind: output, shape index: {}]  }
   0x1   :  { %9 = vsyncpa [#allocation3 + $0x1], 0 }
   0x2   :  { %10 = vsyncpa [#allocation6], 0 }
   0x3   :  { %12 = vsyncpa [#allocation6 + $0x1], 0 }
   0x4   :  { %13 = vsyncpa [#allocation4], 0  ;;  %s580_s9 = smov 0   ;;  %s582_s10 = smov 0  }
   0x5   :  { %s584_s11 = smov 0   ;;  %s586_s12 = smov 0  }
   0x6 LB: > { %s599_s13 = sadd.s32 4294967295, %s559_s12   ;;  %s602_s14 = sadd.s32 1, %s559_s12   ;;  %s559_s12 = sphi %s586_s12, %s756_s12   ;;  %s555_s11 = sphi %s584_s11, %s755_s11   ;;  %s551_s10 = sphi %s582_s10, %s754_s10   ;;  %s547_s9 = sphi %s580_s9, %s753_s9  }
   0x7   : > { %s23_s15 = ssub.s32 %s559_s12, %s602_s14  ;;  %s26_s16 = sadd.s32 1, %s555_s11 }
   0x8   : > { %p24_p0 = scmp.eq.s32.totalorder %s23_s15, 0  ;;  %p33_p1 = scmp.ne.s32.totalorder %s555_s11, %s551_s10 }
   0x9   : > { %p34_p2 = scmp.eq.s32.totalorder %s559_s12, 0  ;;  %p39_p3 = scmp.ne.s32.totalorder %s551_s10, %s547_s9 }
   0xa   : > { %s612_s17 = scalar_select %p24_p0, %s555_s11, %s26_s16  }
   0xb   : > { %p35_p4 = por %p34_p2, %p33_p1  ;;  %p40_p5 = scmp.eq.s32.totalorder %s599_s13, 0 }
   0xc   : > { %p392_p6 = scmp.lt.s32.totalorder %s559_s12, 2  ;;  %s621_s19 = sand.u32 1, %s555_s11  }
   0xd   : > { %p616_p7 = por %p40_p5, %p39_p3  ;;  %s359_s20 = sshll.u32 %s621_s19, 5 }
   0xe   : > { %s375_s21 = sshll.u32 %s559_s12, 9  ;;  %s114_s25 = scalar_lea.vmem [#allocation2], %s359_s20 }
   0xf   : > { %s746_s18 = scalar_select %p616_p7, 1, 0 }
  0x10   : > { %s630_s24 = scalar_lea.hbm %s742_s0, %s375_s21  ;;  %s122_s26 = sshll.u32 %s114_s25, 4  ;;  %s634_s26 = int_to_ptr.vmem [resolvable:$true] %s122_s26 }
  0x11   : > { %p636_p8 = pnand %p392_p6, %p35_p4  ;;  %s111_s28 = scalar_lea.sflag [#allocation3], %s621_s19 }
  0x12   : > { %s437_s29 = scalar_lea.hbm %s630_s24, 512  ;;  %s442_s4 = scalar_lea.hbm %s742_s0, 1024 }
  0x13   : > { %p438_p11 = scmp.ne.s32.totalorder %s630_s24, %s437_s29  ;;  %p439_p12 = pneg %p636_p8 }
  0x14   : > { %p443_p1 = scmp.lt.s32.totalorder %s630_s24, %s742_s0  ;;  %p444_p2 = scmp.lt.s32.totalorder %s442_s4, %s437_s29 }
  0x15   : > { %p440_p13 = pnand %p439_p12, %p438_p11 }
  0x16   : > { %p445_p3 = por %p444_p2, %p443_p1 }
  0x17   : > { %p441_p0 = pneg %p440_p13 }
  0x19   : > { %p446_p4 = pnand %p445_p3, %p441_p0 }
  0x1b   : > { %449 = shalt.err (!%p446_p4)
}
  0x1c   : > { %s450_s7 = scalar_lea.vmem %s634_s26, 512  ;;  %s561_s8 = smov [#allocation2]  }
  0x1d   : > { %p451_p5 = scmp.ne.s32.totalorder %s634_s26, %s450_s7  ;;  %s455_s9 = sshll.u32 %s561_s8, 4  ;;  %s456_s9 = int_to_ptr.vmem [resolvable:$false] %s455_s9 }
  0x1e   : > { %s457_s15 = scalar_lea.vmem %s456_s9, 1024  ;;  %p458_p13 = scmp.lt.s32.totalorder %s634_s26, %s456_s9 }
  0x1f   : > { %p453_p6 = pnand %p451_p5, %p439_p12  ;;  %p459_p9 = scmp.lt.s32.totalorder %s457_s15, %s450_s7 }
  0x21   : > { %p454_p11 = pneg %p453_p6  ;;  %p460_p10 = por %p459_p9, %p458_p13 }
  0x23   : > { %p461_p1 = pnand %p460_p10, %p454_p11 }
  0x25   : > { %464 = shalt.err (!%p461_p1)
}
  0x26   : > { %388 = dma.hbm_to_vmem [thread:$0]  (!%p636_p8), %s630_s24, 512, %s634_s26, %s111_s28  }
  0x27   : > { %p748_p0 = scmp.lt.s32.totalorder %s559_s12, 3  ;;  %p749_p2 = scmp.ge.s32.totalorder %s559_s12, 1 }
  0x28   : > { %s680_s25 = scalar_lea.hbm %s743_s1, %s375_s21  ;;  %s133_s29 = scalar_lea.vmem [#allocation5], %s359_s20 }
  0x29   : > { %p671_p3 = pnand %p749_p2, %p748_p0  ;;  %s141_s30 = sshll.u32 %s133_s29, 4  ;;  %s142_s30 = int_to_ptr.vmem [resolvable:$true] %s141_s30 }
  0x2a   : > { %s130_s24 = scalar_lea.sflag [#allocation6], %s621_s19  ;;  %s465_s26 = scalar_lea.hbm %s680_s25, 512 }
  0x2b   : > { %s750_s16 = scalar_select %p671_p3, 1, 0 }
  0x2c   : > { %p466_p9 = scmp.ne.s32.totalorder %s680_s25, %s465_s26  ;;  %s470_s3 = scalar_lea.hbm %s743_s1, 1024 }
  0x2d   : > { %p471_p5 = scmp.lt.s32.totalorder %s680_s25, %s743_s1  ;;  %p472_p6 = scmp.lt.s32.totalorder %s470_s3, %s465_s26 }
  0x2e   : > { %p468_p10 = pnand %p466_p9, %p439_p12 }
  0x2f   : > { %p473_p11 = por %p472_p6, %p471_p5 }
  0x30   : > { %p469_p4 = pneg %p468_p10 }
  0x32   : > { %p474_p13 = pnand %p473_p11, %p469_p4 }
  0x34   : > { %477 = shalt.err (!%p474_p13)
}
  0x35   : > { %s478_s20 = scalar_lea.vmem %s142_s30, 512  ;;  %s562_s19 = smov [#allocation5]  }
  0x36   : > { %p479_p1 = scmp.ne.s32.totalorder %s142_s30, %s478_s20  ;;  %s483_s5 = sshll.u32 %s562_s19, 4  ;;  %s484_s5 = int_to_ptr.vmem [resolvable:$false] %s483_s5 }
  0x37   : > { %s485_s6 = scalar_lea.vmem %s484_s5, 1024  ;;  %p486_p9 = scmp.lt.s32.totalorder %s142_s30, %s484_s5 }
  0x38   : > { %p481_p0 = pnand %p479_p1, %p439_p12  ;;  %p487_p10 = scmp.lt.s32.totalorder %s485_s6, %s478_s20 }
  0x3a   : > { %p482_p2 = pneg %p481_p0  ;;  %p488_p7 = por %p487_p10, %p486_p9 }
  0x3c   : > { %p489_p3 = pnand %p488_p7, %p482_p2 }
  0x3e   : > { %492 = shalt.err (!%p489_p3)
}
  0x3f   : > { %391 = dma.hbm_to_vmem [thread:$0]  (!%p636_p8), %s680_s25, 512, %s142_s30, %s130_s24  }
  0x40   : > { %p751_p4 = scmp.ne.s32.totalorder %s750_s16, 0 }
  0x41   : > { %s152_s7 = sand.u32 (!%p751_p4), 1, %s551_s10   ;;  %p752_p12 = scmp.ne.s32.totalorder (!%p751_p4), %s746_s18, 0 }
  0x42   : > { %150 = sbr.rel (%p751_p4) target bundleno = 157 (0x9d), region = 28  ;;  %s366_s8 = sshll.u32 (!%p751_p4), %s152_s7, 5 }
  0x43   : > { %s153_s9 = scalar_lea.sflag (!%p751_p4), [#allocation3], %s152_s7  ;;  %s156_s15 = scalar_lea.vmem (!%p751_p4), [#allocation2], %s366_s8 }
  0x47   : > { %534 = dma.done.wait (%p752_p12), %s153_s9, 512  }
  0x48   : > { %536 = vsyncadd (%p752_p12), %s153_s9, 4294966784  ;;  %s162_s22 = scalar_lea.sflag [#allocation6], %s152_s7  ;;  %s165_s23 = scalar_lea.vmem [#allocation5], %s366_s8 }
  0x49   : > { %538 = dma.done.wait (%p752_p12), %s162_s22, 512  }
  0x4a   : > { %540 = vsyncadd (%p752_p12), %s162_s22, 4294966784  ;;  %p368_p7 = scmp.ne.s32.totalorder %s599_s13, 0 }
  0x4c   : > { %189 = sbr.rel (%p368_p7) target bundleno = 83 (0x53), region = 40 }
  0x51   : > { %v563_v0 = vmov 0.0  }
  0x52   : > { %190 = vst [vmem:[#allocation7] sm:$0xff] %v563_v0 }
  0x53 PF: > { %v191_v1 = vld [vmem:[%s156_s15] sm:$0xff]  ;;  %v192_v2 = vld [vmem:[%s156_s15 + $0x8] sm:$0xff]  ;;  %v193_v3 = vld [vmem:[%s156_s15 + $0x10] sm:$0xff]  ;;  %p369_p8 = scmp.ge.s32.totalorder %s599_s13, 1 }
  0x54   : > { %v194_v4 = vld [vmem:[%s156_s15 + $0x18] sm:$0xff]  ;;  %v195_v5 = vld [vmem:[%s165_s23] sm:$0xff]  ;;  %v196_v6 = vld [vmem:[%s165_s23 + $0x8] sm:$0xff]  ;;  %v199_v7 = vmul.f32 0.5, %v191_v1  ;;  %v200_v8 = vmul.f32 0.5, %v192_v2  ;;  %v201_v9 = vmul.f32 0.5, %v193_v3 }
  0x55   : > { %v197_v10 = vld [vmem:[%s165_s23 + $0x10] sm:$0xff]  ;;  %v198_v11 = vld [vmem:[%s165_s23 + $0x18] sm:$0xff]  ;;  %v202_v12 = vmul.f32 0.5, %v194_v4  ;;  %v215_v13 = vmul.f32 0.5, %v195_v5  ;;  %v216_v14 = vmul.f32 0.5, %v196_v6 }
  0x56   : > { %v203_v15 = vadd.f32 0.5, %v199_v7  ;;  %v204_v16 = vadd.f32 0.5, %v200_v8  ;;  %v205_v17 = vadd.f32 0.5, %v201_v9  ;;  %v217_v18 = vmul.f32 0.5, %v197_v10 }
  0x57   : > { %v206_v19 = vadd.f32 0.5, %v202_v12  ;;  %v218_v20 = vmul.f32 0.5, %v198_v11  ;;  %v219_v21 = vsub.f32 0.5, %v215_v13  ;;  %v220_v22 = vsub.f32 0.5, %v216_v14 }
  0x58   : > { %v207_v23 = vmax.f32 %v203_v15, 1e-06  ;;  %v208_v24 = vmax.f32 %v204_v16, 1e-06  ;;  %v209_v25 = vmax.f32 %v205_v17, 1e-06 }
  0x59   : > { %v210_v26 = vmax.f32 %v206_v19, 1e-06  ;;  %v221_v27 = vsub.f32 0.5, %v217_v18  ;;  %v222_v28 = vsub.f32 0.5, %v218_v20  ;;  %v223_v29 = vmax.f32 %v219_v21, 1e-06 }
  0x5a   : > { %v211_v30 = vmin.f32 %v207_v23, 0.999999  ;;  %v212_v31 = vmin.f32 %v208_v24, 0.999999  ;;  %v213_v32 = vmin.f32 %v209_v25, 0.999999 }
  0x5b   : > { %v224_v33 = vmax.f32 %v220_v22, 1e-06  ;;  %v225_v34 = vmax.f32 %v221_v27, 1e-06  ;;  %v214_v35 = vmin.f32 %v210_v26, 0.999999 }
  0x5c   : > { %v226_v36 = vmax.f32 %v222_v28, 1e-06  ;;  %v227_v37 = vmin.f32 %v223_v29, 0.999999 }
  0x5d   : > { %v228_v38 = vmin.f32 %v224_v33, 0.999999  ;;  %v229_v39 = vmin.f32 %v225_v34, 0.999999 }
  0x5e   : > { %v230_v40 = vmin.f32 %v226_v36, 0.999999  ;;  %v231_v41 = vmul.f32 %v227_v37, %v211_v30 }
  0x5f   : > { %v232_v42 = vmul.f32 %v228_v38, %v212_v31  ;;  %v233_v43 = vmul.f32 %v229_v39, %v213_v32 }
  0x60   : > { %v234_v44 = vmul.f32 %v230_v40, %v214_v35  ;;  %429 = vlog2.f32 %v231_v41 }
  0x61   : > { %431 = vlog2.f32 %v232_v42 }
  0x62   : > { %433 = vlog2.f32 %v233_v43 }
  0x63   : > { %435 = vlog2.f32 %v234_v44 }
  0x6d   : > { %v430_v45 = vpop.eup %429  ;;  %246 = sbr.rel (%p369_p8) target bundleno = 122 (0x7a), region = 44 }
  0x6e   : > { %v432_v46 = vpop.eup %431  ;;  %v236_v47 = vmul.f32 0.6931472, %v430_v45 }
  0x6f   : > { %v434_v48 = vpop.eup %433  ;;  %v238_v49 = vmul.f32 0.6931472, %v432_v46 }
  0x70   : > { %v436_v50 = vpop.eup %435  ;;  %v240_v51 = vmul.f32 0.6931472, %v434_v48 }
  0x71   : > { %v242_v52 = vmul.f32 0.6931472, %v436_v50 }
  0x72   : > { %v248_v53 = vadd.f32 %v238_v49, %v236_v47  ;;  %v247_v55 = vld [vmem:[#allocation7] sm:$0xff] }
  0x73   : > { %v249_v54 = vadd.f32 %v242_v52, %v240_v51 }
  0x75   : > { %v250_v56 = vadd.f32 %v249_v54, %v248_v53 }
  0x77   : > { %v251_v57 = vadd.f32 %v250_v56, %v247_v55 }
  0x79   : > { %252 = vst [vmem:[#allocation7] sm:$0xff] %v251_v57 }
  0x7a PF: > { %p370_p3 = scmp.ne.s32.totalorder %s599_s13, 1 }
  0x7c   : > { %256 = sbr.rel (%p370_p3) target bundleno = 142 (0x8e), region = 48 }
  0x81   : > { %v257_v58 = vlaneseq  ;;  %v270_v2 = vld [vmem:[#allocation7] sm:$0xff] }
  0x83   : > { %v258_v59 = vshrl.u32 %v257_v58, 7 }
  0x85   : > { %vm259_vm0 = vcmp.lt.s32.totalorder %v258_v59, 4 }
  0x86   : > { %v262_v60 = vsel %vm259_vm0, %v236_v47, 0.0  ;;  %v263_v61 = vsel %vm259_vm0, %v238_v49, 0.0  ;;  %v264_v62 = vsel %vm259_vm0, %v240_v51, 0.0  ;;  %v265_v63 = vsel %vm259_vm0, %v242_v52, 0.0 }
  0x87   : > { %v271_v0 = vadd.f32 %v263_v61, %v262_v60  ;;  %v272_v1 = vadd.f32 %v265_v63, %v264_v62 }
  0x89   : > { %v273_v3 = vadd.f32 %v272_v1, %v271_v0 }
  0x8b   : > { %v274_v4 = vadd.f32 %v273_v3, %v270_v2 }
  0x8d   : > { %275 = vst [vmem:[#allocation7] sm:$0xff] %v274_v4 }
  0x8e PF: > { %p393_p5 = scmp.eq.s32.totalorder %s599_s13, 1  ;;  %s564_s18 = smov [#allocation7]  }
  0x8f   : > { %s283_s27 = sshll.u32 %s564_s18, 4  ;;  %s284_s27 = int_to_ptr.vmem [resolvable:$true] %s283_s27 }
  0x90   : > { %s493_s16 = scalar_lea.vmem %s284_s27, 128  ;;  %p500_p1 = scmp.lt.s32.totalorder %s284_s27, %s284_s27 }
  0x91   : > { %p494_p6 = scmp.ne.s32.totalorder %s284_s27, %s493_s16  ;;  %p501_p0 = scmp.lt.s32.totalorder %s493_s16, %s493_s16 }
  0x93   : > { %p495_p11 = pnand %p494_p6, %p393_p5  ;;  %p502_p2 = por %p501_p0, %p500_p1 }
  0x95   : > { %p496_p13 = pneg %p495_p11 }
  0x97   : > { %p503_p9 = pnand %p502_p2, %p496_p13 }
  0x99   : > { %506 = shalt.err (!%p503_p9)
}
  0x9a   : > { %382 = dma.vmem_to_hbm [thread:$0]  (%p393_p5), %s284_s27, 128, %s744_s2, [#allocation4]  }
  0x9b   : > { %542 = dma.done.wait (%p393_p5), [#allocation4], 128  }
  0x9c   : > { %544 = vsyncadd (%p393_p5), [#allocation4], 4294967168 }
  0x9d PF: > { %p16_p10 = scmp.ge.s32.totalorder %s602_s14, 4   ;;  %s753_s9 = smov %s551_s10 }
  0x9e   : > { %s754_s10 = smov %s555_s11  ;;  %s755_s11 = smov %s612_s17 }
  0x9f   : > { %s756_s12 = smov %s602_s14  ;;  %18 = sbr.rel (!%p16_p10) target bundleno = 6 (0x6), region = 90 }
  0xa4   :  { %296 = vsyncpa [#allocation3], 1 }
  0xa5   :  { %298 = vsyncpa [#allocation3 + $0x1], 1 }
  0xa6   :  { %299 = vsyncpa [#allocation6], 1 }
  0xa7   :  { %301 = vsyncpa [#allocation6 + $0x1], 1 }
  0xa8   :  { %302 = vsyncpa [#allocation4], 1 }
  0xa9   :  { %304 = vsyncpa [#allocation4 + $0x1], 1 }

</bundles_post_ra>
